<compile_context>
chip_gen: v5e
topology: v5e:2x2
jax: 0.10.0
libtpu: 0.0.40
codegen_flags: <defaults>
</compile_context>

<pallas_src>
import jax
import jax.numpy as jnp
import numpy as np
from jax.experimental import pallas as pl
from jax.experimental.pallas import tpu as pltpu


def _fused_constant():
    """(64, 96) 0/1 matrix applied to [visibility(32) | interleaved logits(32)].

    Result columns 0:64  = vis64  with vis64[:, j]       = vis[:, j // 2]
    Result columns 64:96 = deint  with deint[:, 8*k + b] = logits[:, 4*b + k]
    """
    w = np.zeros((64, 96), np.float32)
    for i in range(32):
        w[i, 2 * i] = 1.0
        w[i, 2 * i + 1] = 1.0
    for b in range(8):
        for k in range(4):
            w[32 + 4 * b + k, 64 + 8 * k + b] = 1.0
    return jnp.asarray(w)


def _corners_loss_kernel(preds_ref, targets_ref, w_ref, out_ref):
    # Cast in VMEM (no-op for f32 inputs; halves HBM reads for bf16 callers).
    p = preds_ref[...].astype(jnp.float32)    # (tr, 96)
    t = targets_ref[...].astype(jnp.float32)  # (tr, 104)

    # ---- regression: squared error masked by per-corner visibility ----
    diff = p[:, 0:64] - t[:, 0:64]            # (tr, 64)

    # One constant matmul on the otherwise-idle MXU does both the visibility
    # 2x lane-expansion and the class-logit de-interleave.  (Mosaic keeps f32
    # matmuls exact; verified against the pure-JAX reference at 1e-5.)
    vl = jnp.concatenate([t[:, 64:96], p[:, 64:96]], axis=1)            # (tr, 64)
    vd = jnp.dot(vl, w_ref[...], preferred_element_type=jnp.float32)    # (tr, 96)
    vis64 = vd[:, 0:64]
    deint = vd[:, 64:96]                      # col 8*k + b = class k of box b

    reg_loss = diff * diff * vis64            # (tr, 64)

    # ---- classification: stable CE over 4 classes for each of 8 boxes ----
    l0 = deint[:, 0:8]
    l1 = deint[:, 8:16]
    l2 = deint[:, 16:24]
    l3 = deint[:, 24:32]
    m = jnp.maximum(jnp.maximum(l0, l1), jnp.maximum(l2, l3))           # (tr, 8)
    m32 = jnp.concatenate([m, m, m, m], axis=1)                         # (tr, 32)
    e = jnp.exp(deint - m32)                  # single lane-dense EUP pass
    s = e[:, 0:8] + e[:, 8:16] + e[:, 16:24] + e[:, 24:32]              # (tr, 8)
    lse = m + jnp.log(s)

    tgt = t[:, 96:104]                        # float-encoded class index {0,1,2,3}
    picked = jnp.where(tgt < 0.5, l0,
             jnp.where(tgt < 1.5, l1,
             jnp.where(tgt < 2.5, l2, l3)))
    cls_loss = lse - picked                   # (tr, 8)

    # All ops above are purely row-wise, so garbage rows in a ragged tail block
    # never contaminate valid rows (they are simply not written back).
    out_ref[...] = jnp.concatenate([reg_loss, cls_loss], axis=1).astype(out_ref.dtype)


def _lane_pad(n):
    return ((n + 127) // 128) * 128


def corners_stable_loss(preds, targets, *, row_tile=None):
    N, M = preds.shape[:2]
    R = N * M
    assert preds.shape[-1] == 96 and targets.shape[-1] == 104

    # Contiguous, free reshapes; native dtypes (no HBM round-trip casts).
    preds2 = preds.reshape(R, 96)
    targets2 = targets.reshape(R, 104)
    out_dtype = preds2.dtype

    # Generation-aware tiling.
    try:
        vmem_cap = int(pltpu.get_tpu_info().vmem_capacity_bytes)
    except Exception:
        vmem_cap = None                        # conservative fallback below
    small_vmem = vmem_cap is not None and vmem_cap <= (64 << 20)   # v7x-like

    auto_tile = row_tile is None
    if auto_tile:
        row_tile = 8192 if (small_vmem or vmem_cap is None) else 16384
    # Keep the (8, 128) sublane rule even for user-supplied tiles.
    row_tile = max(8, ((int(row_tile) + 7) // 8) * 8)

    tr = min(row_tile, R)
    # On 2-TC chips (64-MiB VMEM generation) make a moderately sized problem
    # still yield >= 2 grid steps so ("parallel",) spreads across both cores.
    if auto_tile and small_vmem and tr == R and R >= 1024:
        tr = (((R + 1) // 2 + 7) // 8) * 8
    grid = (pl.cdiv(R, tr),)

    # VMEM budget: double-buffered lane-padded blocks + compute headroom,
    # capped safely below the physical capacity of the current generation.
    per_row = (_lane_pad(96) * preds2.dtype.itemsize
               + _lane_pad(104) * targets2.dtype.itemsize
               + _lane_pad(72) * out_dtype.itemsize)
    need = int(2 * tr * per_row * 1.75) + (4 << 20)
    hard_cap = (vmem_cap - (8 << 20)) if vmem_cap else (56 << 20)
    vmem_limit = int(max(32 << 20, min(need, hard_cap)))

    w = _fused_constant()

    out = pl.pallas_call(
        _corners_loss_kernel,
        out_shape=jax.ShapeDtypeStruct((R, 72), out_dtype),
        grid_spec=pltpu.PrefetchScalarGridSpec(
            num_scalar_prefetch=0,
            grid=grid,
            in_specs=[
                pl.BlockSpec((tr, 96), lambda i: (i, 0)),
                pl.BlockSpec((tr, 104), lambda i: (i, 0)),
                # Constant matrix: same block every step -> stays resident.
                pl.BlockSpec((64, 96), lambda i: (0, 0)),
            ],
            out_specs=pl.BlockSpec((tr, 72), lambda i: (i, 0)),
        ),
        compiler_params=pltpu.CompilerParams(
            dimension_semantics=("parallel",),
            vmem_limit_bytes=vmem_limit),
    )(preds2, targets2, w)

    return out.reshape(N, M, 72)


def _reference(preds, targets):
    """Pure-JAX mirror of the PyTorch forward for verification."""
    N, M = preds.shape[:2]
    preds = preds.astype(jnp.float32)
    targets = targets.astype(jnp.float32)
    reg = (preds[..., :64] - targets[..., :64]) ** 2 \
        * jnp.repeat(targets[..., 64:96], 2, axis=-1)
    logits = preds[..., 64:96].reshape(N, M, 8, 4)
    tgt = targets[..., 96:104].astype(jnp.int32)
    lse = jax.nn.logsumexp(logits, axis=-1)
    picked = jnp.take_along_axis(logits, tgt[..., None], axis=-1)[..., 0]
    return jnp.concatenate([reg, lse - picked], axis=-1)


def _make_inputs(key, N, M):
    kp, kt, kv, kc = jax.random.split(key, 4)
    preds = jax.random.normal(kp, (N, M, 96), dtype=jnp.float32)
    reg_targets = jax.random.normal(kt, (N, M, 64), dtype=jnp.float32)
    visibility = jax.random.bernoulli(kv, 0.7, (N, M, 32)).astype(jnp.float32)
    cls_targets = jax.random.randint(kc, (N, M, 8), 0, 4).astype(jnp.float32)
    targets = jnp.concatenate([reg_targets, visibility, cls_targets], axis=-1)
    return preds, targets


if __name__ == "__main__":
    k0, k1 = jax.random.split(jax.random.PRNGKey(0), 2)

    # Primary case: N=2, M=8 -> R=16 rows, single grid step at this demo size.
    preds, targets = _make_inputs(k0, 2, 8)
    ref = _reference(preds, targets)

    out = jax.block_until_ready(corners_stable_loss(preds, targets))
    assert out.shape == (2, 8, 72), out.shape
    assert jnp.allclose(out, ref, atol=1e-5, rtol=1e-5), \
        float(jnp.max(jnp.abs(out - ref)))

    # Multi-step grid (2 tiles of 8 rows) exercising the resident constant block.
    out2 = jax.block_until_ready(corners_stable_loss(preds, targets, row_tile=8))
    assert jnp.allclose(out2, ref, atol=1e-5, rtol=1e-5), \
        float(jnp.max(jnp.abs(out2 - ref)))

    # Ragged grid: R=18 rows with 8-row tiles -> partial tail block.
    preds_r, targets_r = _make_inputs(k1, 3, 6)
    ref_r = _reference(preds_r, targets_r)
    out_r = jax.block_until_ready(corners_stable_loss(preds_r, targets_r, row_tile=8))
    assert jnp.allclose(out_r, ref_r, atol=1e-5, rtol=1e-5), \
        float(jnp.max(jnp.abs(out_r - ref_r)))

    print("KERNEL_OK")
</pallas_src>

<mosaic_0001>
module attributes {stable_mosaic.version = 11 : i64} {
  func.func @_corners_loss_kernel(%arg0: i32, %arg1: memref<16x96xf32, #tpu.memory_space<vmem>>, %arg2: memref<16x104xf32, #tpu.memory_space<vmem>>, %arg3: memref<64x96xf32, #tpu.memory_space<vmem>>, %arg4: memref<16x72xf32, #tpu.memory_space<vmem>>) attributes {dimension_semantics = [#tpu.dimension_semantics<parallel>], iteration_bounds = array<i64: 1>, scalar_prefetch = 0 : i64, scratch_operands = 0 : i64, tpu.core_type = #tpu.core_type<tc>, window_params = [{transform_indices = @transform_0, window_bounds = array<i64: 16, 96>}, {transform_indices = @transform_1, window_bounds = array<i64: 16, 104>}, {pipeline_mode = #tpu.pipeline_mode<synchronous>, transform_indices = @transform_2, window_bounds = array<i64: 64, 96>}, {transform_indices = @transform_3, window_bounds = array<i64: 16, 72>}]} {
    %c0 = arith.constant 0 : index
    %c0_0 = arith.constant 0 : index
    %0 = vector.load %arg1[%c0, %c0_0] : memref<16x96xf32, #tpu.memory_space<vmem>>, vector<16x96xf32>
    %c0_1 = arith.constant 0 : index
    %c0_2 = arith.constant 0 : index
    %1 = vector.load %arg2[%c0_1, %c0_2] : memref<16x104xf32, #tpu.memory_space<vmem>>, vector<16x104xf32>
    %2 = vector.extract_strided_slice %0 {offsets = [0, 0], sizes = [16, 64], strides = [1, 1]} : vector<16x96xf32> to vector<16x64xf32>
    %3 = vector.extract_strided_slice %1 {offsets = [0, 0], sizes = [16, 64], strides = [1, 1]} : vector<16x104xf32> to vector<16x64xf32>
    %4 = arith.subf %2, %3 : vector<16x64xf32>
    %5 = vector.extract_strided_slice %1 {offsets = [0, 64], sizes = [16, 32], strides = [1, 1]} : vector<16x104xf32> to vector<16x32xf32>
    %6 = vector.extract_strided_slice %0 {offsets = [0, 64], sizes = [16, 32], strides = [1, 1]} : vector<16x96xf32> to vector<16x32xf32>
    %7 = tpu.concatenate %5, %6 in 1 : vector<16x32xf32>, vector<16x32xf32> -> vector<16x64xf32>
    %c0_3 = arith.constant 0 : index
    %c0_4 = arith.constant 0 : index
    %8 = vector.load %arg3[%c0_3, %c0_4] : memref<64x96xf32, #tpu.memory_space<vmem>>, vector<64x96xf32>
    %cst = arith.constant dense<0.000000e+00> : vector<16x96xf32>
    %9 = tpu.matmul %7, %8, %cst {dimension_numbers = #tpu.dot_dimension_numbers<[1], [0], [0], [1], [0, 0, 1, 1], [], []>} : vector<16x64xf32>, vector<64x96xf32>, vector<16x96xf32> -> vector<16x96xf32>
    %10 = vector.extract_strided_slice %9 {offsets = [0, 0], sizes = [16, 64], strides = [1, 1]} : vector<16x96xf32> to vector<16x64xf32>
    %11 = vector.extract_strided_slice %9 {offsets = [0, 64], sizes = [16, 32], strides = [1, 1]} : vector<16x96xf32> to vector<16x32xf32>
    %12 = arith.mulf %4, %4 : vector<16x64xf32>
    %13 = arith.mulf %12, %10 : vector<16x64xf32>
    %14 = vector.extract_strided_slice %11 {offsets = [0, 0], sizes = [16, 8], strides = [1, 1]} : vector<16x32xf32> to vector<16x8xf32>
    %15 = vector.extract_strided_slice %11 {offsets = [0, 8], sizes = [16, 8], strides = [1, 1]} : vector<16x32xf32> to vector<16x8xf32>
    %16 = vector.extract_strided_slice %11 {offsets = [0, 16], sizes = [16, 8], strides = [1, 1]} : vector<16x32xf32> to vector<16x8xf32>
    %17 = vector.extract_strided_slice %11 {offsets = [0, 24], sizes = [16, 8], strides = [1, 1]} : vector<16x32xf32> to vector<16x8xf32>
    %18 = arith.maximumf %14, %15 : vector<16x8xf32>
    %19 = arith.maximumf %16, %17 : vector<16x8xf32>
    %20 = arith.maximumf %18, %19 : vector<16x8xf32>
    %21 = tpu.concatenate %20, %20, %20, %20 in 1 : vector<16x8xf32>, vector<16x8xf32>, vector<16x8xf32>, vector<16x8xf32> -> vector<16x32xf32>
    %22 = arith.subf %11, %21 : vector<16x32xf32>
    %23 = math.exp %22 : vector<16x32xf32>
    %24 = vector.extract_strided_slice %23 {offsets = [0, 0], sizes = [16, 8], strides = [1, 1]} : vector<16x32xf32> to vector<16x8xf32>
    %25 = vector.extract_strided_slice %23 {offsets = [0, 8], sizes = [16, 8], strides = [1, 1]} : vector<16x32xf32> to vector<16x8xf32>
    %26 = arith.addf %24, %25 : vector<16x8xf32>
    %27 = vector.extract_strided_slice %23 {offsets = [0, 16], sizes = [16, 8], strides = [1, 1]} : vector<16x32xf32> to vector<16x8xf32>
    %28 = arith.addf %26, %27 : vector<16x8xf32>
    %29 = vector.extract_strided_slice %23 {offsets = [0, 24], sizes = [16, 8], strides = [1, 1]} : vector<16x32xf32> to vector<16x8xf32>
    %30 = arith.addf %28, %29 : vector<16x8xf32>
    %31 = math.log %30 : vector<16x8xf32>
    %32 = arith.addf %20, %31 : vector<16x8xf32>
    %33 = vector.extract_strided_slice %1 {offsets = [0, 96], sizes = [16, 8], strides = [1, 1]} : vector<16x104xf32> to vector<16x8xf32>
    %cst_5 = arith.constant 5.000000e-01 : f32
    %34 = vector.broadcast %cst_5 : f32 to vector<16x8xf32>
    %35 = arith.cmpf olt, %33, %34 : vector<16x8xf32>
    %cst_6 = arith.constant 1.500000e+00 : f32
    %36 = vector.broadcast %cst_6 : f32 to vector<16x8xf32>
    %37 = arith.cmpf olt, %33, %36 : vector<16x8xf32>
    %cst_7 = arith.constant 2.500000e+00 : f32
    %38 = vector.broadcast %cst_7 : f32 to vector<16x8xf32>
    %39 = arith.cmpf olt, %33, %38 : vector<16x8xf32>
    %40 = arith.select %39, %16, %17 : vector<16x8xi1>, vector<16x8xf32>
    %41 = arith.select %37, %15, %40 : vector<16x8xi1>, vector<16x8xf32>
    %42 = arith.select %35, %14, %41 : vector<16x8xi1>, vector<16x8xf32>
    %43 = arith.subf %32, %42 : vector<16x8xf32>
    %44 = tpu.concatenate %13, %43 in 1 : vector<16x64xf32>, vector<16x8xf32> -> vector<16x72xf32>
    %c0_8 = arith.constant 0 : index
    %c0_9 = arith.constant 0 : index
    %45 = vector.load %arg4[%c0_8, %c0_9] : memref<16x72xf32, #tpu.memory_space<vmem>>, vector<16x72xf32>
    tpu.vector_store %arg4[%c0_8, %c0_9], %44 {strides = array<i32>} : memref<16x72xf32, #tpu.memory_space<vmem>>, vector<16x72xf32>,
    return
  }
  func.func @transform_0(%arg0: i32) -> (i32, i32) {
    %c0_i32 = arith.constant 0 : i32
    %c0_i32_0 = arith.constant 0 : i32
    return %arg0, %c0_i32 : i32, i32
  }
  func.func @transform_1(%arg0: i32) -> (i32, i32) {
    %c0_i32 = arith.constant 0 : i32
    %c0_i32_0 = arith.constant 0 : i32
    return %arg0, %c0_i32 : i32, i32
  }
  func.func @transform_2(%arg0: i32) -> (i32, i32) {
    %c0_i32 = arith.constant 0 : i32
    %c0_i32_0 = arith.constant 0 : i32
    %c0_i32_1 = arith.constant 0 : i32
    return %c0_i32, %c0_i32_0 : i32, i32
  }
  func.func @transform_3(%arg0: i32) -> (i32, i32) {
    %c0_i32 = arith.constant 0 : i32
    %c0_i32_0 = arith.constant 0 : i32
    return %arg0, %c0_i32 : i32, i32
  }
}

</mosaic_0001>

<bundles_post_ra>
// kernel: tpu_custom_call.1
= control target key start
LH: loop header
LB: loop body
LE: loop exit
PB: predicated region body
PF: predicated region fallthrough
CT: control target
= control target key end

     0   :  { %8 = vsyncpa [#allocation3], 0  ;;  %s581_s0 = inlined_call_operand.hbm [shape: f32[16,96], index: 0, kind: input, shape index: {}]   ;;  %s582_s1 = inlined_call_operand.hbm [shape: f32[16,104], index: 1, kind: input, shape index: {}]   ;;  %s583_s2 = inlined_call_operand.hbm [shape: f32[64,96], index: 2, kind: input, shape index: {}]   ;;  %s584_s3 = inlined_call_operand.hbm [shape: f32[16,72], index: 3, kind: output, shape index: {}]  }
   0x1   :  { %9 = vsyncpa [#allocation6], 0 }
   0x2   :  { %10 = vsyncpa [#allocation4], 0  ;;  %s28_s14 = sshll.u32 %s582_s1, 4  ;;  %s438_s15 = smov [#allocation5]   ;;  %s29_s14 = int_to_ptr.hbm [resolvable:$true] %s28_s14 }
   0x3   :  { %s30_s16 = sshll.u32 %s438_s15, 4  ;;  %s15_s19 = sshll.u32 %s581_s0, 4  ;;  %s31_s16 = int_to_ptr.vmem [resolvable:$true] %s30_s16  ;;  %s16_s19 = int_to_ptr.hbm [resolvable:$true] %s15_s19 }
   0x4   :  { %s439_s20 = smov 128   ;;  %s440_s21 = smov 8  }
   0x5   :  { %36 = dma.hbm_to_vmem [thread:$0]  %s29_s14, 256, %s31_s16, [#allocation6], %s439_s20, %s439_s20, %s440_s21  }
   0x6   :  { %s441_s22 = smov [#allocation2]   ;;  %s41_s1 = sshll.u32 %s583_s2, 4  ;;  %s42_s1 = int_to_ptr.hbm [resolvable:$true] %s41_s1 }
   0x7   :  { %s17_s23 = sshll.u32 %s441_s22, 4  ;;  %s442_s0 = smov [#allocation7]   ;;  %s18_s23 = int_to_ptr.vmem [resolvable:$true] %s17_s23 }
   0x8   :  { %23 = dma.hbm_to_vmem [thread:$0]  %s16_s19, 256, %s18_s23, [#allocation3], %s439_s20, %s439_s20, %s440_s21  }
   0x9   :  { %s43_s26 = sshll.u32 %s442_s0, 4  ;;  %s44_s26 = int_to_ptr.vmem [resolvable:$true] %s43_s26 }
   0xa   :  { %49 = dma.hbm_to_vmem [thread:$0]  %s42_s1, 1024, %s44_s26, [#allocation6], %s439_s20, %s439_s20, %s440_s21  }
   0xb   :  { %432 = dma.done.wait [#allocation3], 256  }
   0xc   :  { %433 = vsyncadd [#allocation3], 4294967040 }
   0xd   :  { %434 = dma.done.wait [#allocation6], 1280  }
   0xe   :  { %435 = vsyncadd [#allocation6], 4294966016  ;;  %v493_v0 = vld [vmem:[#allocation5] sm:$0xff]  ;;  %v495_v1 = vld [vmem:[#allocation2] sm:$0xff]  ;;  %s443_s2 = smov 64   ;;  %s444_s27 = smov 96  }
   0xf   :  { %70 = vrot.lane.b32.xlu0 %v493_v0, %s443_s2  ;;  %78 = vrot.lane.b32.xlu1 %v495_v1, %s444_s27  ;;  %v94_v2 = vld [vmem:[#allocation7 + $0x38] sm:$0xff]  ;;  %v93_v3 = vld [vmem:[#allocation7 + $0x30] sm:$0xff]  ;;  %v92_v4 = vld [vmem:[#allocation7 + $0x28] sm:$0xff]  ;;  %vm84_vm0 = vcmask 261120   ;;  %vm95_vm1 = vcmask 523264   ;;  %s445_s28 = smov 120  }
  0x10   :  { %110 = vmatpush.msra.mxu0 %v94_v2  ;;  %303 = vmatpush.msra.mxu1 %v94_v2  ;;  %v91_v5 = vld [vmem:[#allocation7 + $0x20] sm:$0xff]  ;;  %v501_v6 = vld [vmem:[#allocation5 + $0x8] sm:$0xff]  ;;  %v503_v7 = vld [vmem:[#allocation2 + $0x8] sm:$0xff]  ;;  %s446_s29 = smov 112   ;;  %s447_s30 = smov 72   ;;  %vm175_vm2 = vcmask 64512  }
  0x11   :  { %v90_v8 = vld [vmem:[#allocation7 + $0x18] sm:$0xff]  ;;  %v89_v9 = vld [vmem:[#allocation7 + $0x10] sm:$0xff]  ;;  %v88_v10 = vld [vmem:[#allocation7 + $0x8] sm:$0xff]  ;;  %s448_s4 = smov 80   ;;  %s449_s5 = smov 88   ;;  %vm181_vm3 = vcmask 195584  }
  0x12   :  { %111 = vmatpush.msra.mxu0 %v93_v3  ;;  %304 = vmatpush.msra.mxu1 %v93_v3  ;;  %v87_v11 = vld [vmem:[#allocation7] sm:$0xff]  ;;  %s450_s6 = smov 16   ;;  %s451_s7 = smov 32   ;;  %vm178_vm4 = vcmask 130048   ;;  %vm235_vm5 = vcmp.lt.f32.partialorder %v501_v6, 2.5  ;;  %vm234_vm6 = vcmp.lt.f32.partialorder %v493_v0, 2.5 }
  0x13   :  { %s452_s8 = smov 24   ;;  %s453_s9 = smov 104   ;;  %vm232_vm7 = vcmp.lt.f32.partialorder %v493_v0, 1.5  ;;  %vm233_vm8 = vcmp.lt.f32.partialorder %v501_v6, 1.5  ;;  %vm231_vm9 = vcmp.lt.f32.partialorder %v501_v6, 0.5  ;;  %vm230_vm10 = vcmp.lt.f32.partialorder %v493_v0, 0.5 }
  0x14   :  { %112 = vmatpush.msra.mxu0 %v92_v4  ;;  %305 = vmatpush.msra.mxu1 %v92_v4  ;;  %vm278_vm11 = vcmask 588800   ;;  %s454_s10 = smov [#allocation8]   ;;  %s287_s14 = sshll.u32 %s584_s3, 4  ;;  %s288_s14 = int_to_ptr.hbm [resolvable:$true] %s287_s14 }
  0x15   :  { %s285_s11 = sshll.u32 %s454_s10, 4  ;;  %s286_s11 = int_to_ptr.vmem [resolvable:$true] %s285_s11 }
  0x16   :  { %113 = vmatpush.msra.mxu0 %v91_v5  ;;  %306 = vmatpush.msra.mxu1 %v91_v5 }
  0x17   :  { %72 = vrot.lane.b32.xlu0 %v501_v6, %s443_s2  ;;  %80 = vrot.lane.b32.xlu1 %v503_v7, %s444_s27 }
  0x18   :  { %114 = vmatpush.msra.mxu0 %v90_v8  ;;  %307 = vmatpush.msra.mxu1 %v90_v8 }
  0x1a   :  { %115 = vmatpush.msra.mxu0 %v89_v9  ;;  %308 = vmatpush.msra.mxu1 %v89_v9 }
  0x1c   :  { %116 = vmatpush.msra.mxu0 %v88_v10  ;;  %309 = vmatpush.msra.mxu1 %v88_v10 }
  0x1e   :  { %117 = vmatpush.msra.mxu0 %v87_v11  ;;  %310 = vmatpush.msra.mxu1 %v87_v11 }
  0x81   :  { %v71_v12 = vpop.permute.xlu0 %70  ;;  %v79_v13 = vpop.permute.xlu1 %78 }
  0x82   :  { %v85_v14 = vsel %vm84_vm0, %v71_v12, %v79_v13 }
  0x83   :  { %301 = vmatmul.msk.f32.vlgmr.msra.gmra.mxu0 %vm95_vm1, %v85_v14  ;;  %v66_v14 = vsub.f32 %v495_v1, %v493_v0 }
  0x89   :  { %v73_v15 = vpop.permute.xlu0 %72  ;;  %v81_v16 = vpop.permute.xlu1 %80 }
  0x8a   :  { %v86_v17 = vsel %vm84_vm0, %v73_v15, %v81_v16 }
  0x8b   :  { %302 = vmatmul.msk.f32.vlgmr.msra.gmra.mxu1 %vm95_vm1, %v86_v17 }
 0x100   :  { %v511_v18 = vpop.f32.mrf.mxu0 }
 0x101   :  { %131 = vrot.lane.b32.xlu2 %v511_v18, %s445_s28 }
 0x108   :  { %v515_v19 = vpop.f32.mrf.mxu1 }
 0x109   :  { %133 = vrot.lane.b32.xlu2 %v515_v19, %s445_s28 }
 0x15b   :  { %v132_v20 = vpop.permute.xlu2 %131 }
 0x15c   :  { %v137_v21 = vmax.f32 %v511_v18, %v132_v20  ;;  %v125_v20 = vmul.f32 %v66_v14, %v66_v14 }
 0x15e   :  { %141 = vrot.lane.b32.xlu0 %v137_v21, %s446_s29 }
 0x163   :  { %v134_v22 = vpop.permute.xlu2 %133 }
 0x164   :  { %v138_v23 = vmax.f32 %v515_v19, %v134_v22  ;;  %v67_v22 = vsub.f32 %v503_v7, %v501_v6 }
 0x166   :  { %143 = vrot.lane.b32.xlu1 %v138_v23, %s446_s29 }
 0x1d0   :  { %v142_v24 = vpop.permute.xlu0 %141 }
 0x1d1   :  { %v523_v25 = vmax.f32 %v137_v21, %v142_v24 }
 0x1d3   :  { %151 = vrot.lane.b32.xlu2 %v523_v25, %s443_s2  ;;  %157 = vrot.lane.b32.xlu1 %v523_v25, %s447_s30 }
 0x1d8   :  { %v144_v26 = vpop.permute.xlu1 %143 }
 0x1d9   :  { %v528_v27 = vmax.f32 %v138_v23, %v144_v26 }
 0x1db   :  { %165 = vrot.lane.b32.xlu1 %v528_v27, %s448_s4  ;;  %159 = vrot.lane.b32.xlu2 %v528_v27, %s447_s30 }
 0x1dc   :  { %153 = vrot.lane.b32.xlu0 %v528_v27, %s443_s2 }
 0x1e3   :  { %169 = vrot.lane.b32.xlu2 %v523_v25, %s449_s5 }
 0x1e4   :  { %163 = vrot.lane.b32.xlu0 %v523_v25, %s448_s4 }
 0x1ec   :  { %171 = vrot.lane.b32.xlu0 %v528_v27, %s449_s5 }
 0x1f4   :  { %236 = vrot.lane.b32.xlu0 %v511_v18, %s450_s6 }
 0x1fc   :  { %244 = vrot.lane.b32.xlu0 %v515_v19, %s440_s21 }
 0x204   :  { %258 = vrot.lane.b32.xlu0 %v511_v18, %s451_s7 }
 0x22d   :  { %v152_v28 = vpop.permute.xlu2 %151 }
 0x235   :  { %v160_v29 = vpop.permute.xlu2 %159 }
 0x23d   :  { %v170_v34 = vpop.permute.xlu2 %169 }
 0x245   :  { %v158_v31 = vpop.permute.xlu1 %157 }
 0x246   :  { %v176_v32 = vsel %vm175_vm2, %v152_v28, %v158_v31  ;;  %v127_v28 = vmul.f32 %v125_v20, %v511_v18 }
 0x24d   :  { %v166_v38 = vpop.permute.xlu1 %165 }
 0x24e   :  { %v154_v30 = vpop.permute.xlu0 %153 }
 0x24f   :  { %v177_v37 = vsel %vm175_vm2, %v154_v30, %v160_v29  ;;  %v126_v30 = vmul.f32 %v67_v22, %v67_v22 }
 0x250   :  { %v180_v39 = vsel %vm178_vm4, %v177_v37, %v166_v38 }
 0x251   :  { %v128_v7 = vmul.f32 %v126_v30, %v515_v19 }
 0x256   :  { %v164_v33 = vpop.permute.xlu0 %163 }
 0x257   :  { %v179_v35 = vsel %vm178_vm4, %v176_v32, %v164_v33 }
 0x258   :  { %v182_v36 = vsel %vm181_vm3, %v179_v35, %v170_v34 }
 0x259   :  { %186 = vrot.lane.b32.xlu1 %v182_v36, %s443_s2 }
 0x25e   :  { %v172_v40 = vpop.permute.xlu0 %171 }
 0x25f   :  { %v183_v41 = vsel %vm181_vm3, %v180_v39, %v172_v40 }
 0x260   :  { %188 = vrot.lane.b32.xlu2 %v183_v41, %s443_s2 }
 0x261   :  { %238 = vrot.lane.b32.xlu1 %v515_v19, %s450_s6 }
 0x266   :  { %v237_v49 = vpop.permute.xlu0 %236 }
 0x268   :  { %242 = vrot.lane.b32.xlu2 %v511_v18, %s440_s21 }
 0x269   :  { %250 = vrot.lane.b32.xlu1 %v511_v18, %s452_s8 }
 0x26e   :  { %v245_v53 = vpop.permute.xlu0 %244 }
 0x270   :  { %252 = vrot.lane.b32.xlu2 %v515_v19, %s452_s8 }
 0x271   :  { %260 = vrot.lane.b32.xlu1 %v515_v19, %s451_s7 }
 0x276   :  { %v259_v62 = vpop.permute.xlu0 %258 }
 0x2ba   :  { %v189_v42 = vpop.permute.xlu2 %188 }
 0x2bb   :  { %v193_v43 = vsub.f32 %v515_v19, %v189_v42 }
 0x2bd   :  { %v196_v44 = vmul.f32 1.442695, %v193_v43 }
 0x2bf   :  { %328 = vpow2.f32 %v196_v44 }
 0x2c2   :  { %v243_v52 = vpop.permute.xlu2 %242 }
 0x2c3   :  { %v248_v56 = vsel %vm234_vm6, %v237_v49, %v243_v52 }
 0x2c5   :  { %v329_v45 = vpop.eup %328 }
 0x2c6   :  { %202 = vrot.lane.b32.xlu0 %v329_v45, %s445_s28 }
 0x2ca   :  { %v253_v57 = vpop.permute.xlu2 %252 }
 0x2cb   :  { %v187_v46 = vpop.permute.xlu1 %186 }
 0x2cc   :  { %v192_v47 = vsub.f32 %v511_v18, %v187_v46 }
 0x2ce   :  { %v194_v48 = vmul.f32 1.442695, %v192_v47 }
 0x2d0   :  { %330 = vpow2.f32 %v194_v48 }
 0x2d3   :  { %v239_v50 = vpop.permute.xlu1 %238 }
 0x2d4   :  { %v249_v55 = vsel %vm235_vm5, %v239_v50, %v245_v53 }
 0x2d5   :  { %v257_v60 = vsel %vm233_vm8, %v253_v57, %v249_v55 }
 0x2d6   :  { %v331_v51 = vpop.eup %330 }
 0x2d7   :  { %208 = vrot.lane.b32.xlu1 %v331_v51, %s446_s29  ;;  %200 = vrot.lane.b32.xlu2 %v331_v51, %s445_s28 }
 0x2d8   :  { %216 = vrot.lane.b32.xlu0 %v331_v51, %s453_s9 }
 0x2db   :  { %v251_v54 = vpop.permute.xlu1 %250 }
 0x2dc   :  { %v256_v58 = vsel %vm232_vm7, %v251_v54, %v248_v56 }
 0x2dd   :  { %v264_v63 = vsel %vm230_vm10, %v259_v62, %v256_v58 }
 0x2df   :  { %218 = vrot.lane.b32.xlu1 %v329_v45, %s453_s9  ;;  %210 = vrot.lane.b32.xlu2 %v329_v45, %s446_s29 }
 0x2e3   :  { %v261_v59 = vpop.permute.xlu1 %260 }
 0x2e4   :  { %v265_v61 = vsel %vm231_vm9, %v261_v59, %v257_v60 }
 0x2e5   :  { %270 = vrot.lane.b32.xlu0 %v265_v61, %s444_s27 }
 0x2e7   :  { %268 = vrot.lane.b32.xlu2 %v264_v63, %s444_s27 }
 0x331   :  { %v201_v2 = vpop.permute.xlu2 %200 }
 0x332   :  { %v206_v4 = vadd.f32 %v331_v51, %v201_v2 }
 0x338   :  { %v203_v3 = vpop.permute.xlu0 %202 }
 0x339   :  { %v207_v10 = vadd.f32 %v329_v45, %v203_v3  ;;  %v211_v12 = vpop.permute.xlu2 %210 }
 0x33b   :  { %v215_v13 = vadd.f32 %v211_v12, %v207_v10 }
 0x341   :  { %v269_v24 = vpop.permute.xlu2 %268 }
 0x349   :  { %v209_v5 = vpop.permute.xlu1 %208 }
 0x34a   :  { %v214_v8 = vadd.f32 %v209_v5, %v206_v4  ;;  %v217_v9 = vpop.permute.xlu0 %216 }
 0x34c   :  { %v222_v11 = vadd.f32 %v217_v9, %v214_v8 }
 0x34e   :  { %332 = vlog2.f32 %v222_v11 }
 0x351   :  { %v219_v15 = vpop.permute.xlu1 %218 }
 0x352   :  { %v223_v16 = vadd.f32 %v219_v15, %v215_v13 }
 0x354   :  { %v333_v17 = vpop.eup %332  ;;  %334 = vlog2.f32 %v223_v16 }
 0x355   :  { %v225_v21 = vmul.f32 0.6931472, %v333_v17 }
 0x357   :  { %v228_v23 = vadd.f32 %v225_v21, %v523_v25  ;;  %v271_v6 = vpop.permute.xlu0 %270 }
 0x359   :  { %v274_v26 = vsub.f32 %v228_v23, %v269_v24 }
 0x35a   :  { %v335_v29 = vpop.eup %334 }
 0x35b   :  { %v227_v31 = vmul.f32 0.6931472, %v335_v29  ;;  %v276_v0 = vsel %vm95_vm1, %v127_v28, %v274_v26 }
 0x35c   :  { %279 = vst.msk [vmem:[#allocation8] sm:$0xff] %vm278_vm11, %v276_v0 }
 0x35d   :  { %v229_v1 = vadd.f32 %v227_v31, %v528_v27 }
 0x35f   :  { %v275_v18 = vsub.f32 %v229_v1, %v271_v6 }
 0x361   :  { %v277_v25 = vsel %vm95_vm1, %v128_v7, %v275_v18 }
 0x362   :  { %280 = vst.msk [vmem:[#allocation8 + $0x8] sm:$0xff] %vm278_vm11, %v277_v25 }
 0x363   :  { %293 = dma.vmem_to_hbm [thread:$0]  %s286_s11, 256, %s288_s14, [#allocation4], %s439_s20, %s439_s20, %s440_s21  }
 0x364   :  { %436 = dma.done.wait [#allocation4], 256  }
 0x365   :  { %437 = vsyncadd [#allocation4], 4294967040 }
 0x366   :  { %298 = vsyncpa [#allocation3], 1 }
 0x367   :  { %299 = vsyncpa [#allocation6], 1 }
 0x368   :  { %300 = vsyncpa [#allocation4], 1 }

</bundles_post_ra>
